<compile_context>
chip_gen: v7x
topology: tpu7x:2x2x1
jax: 0.10.0
libtpu: 0.0.40
codegen_flags: <defaults>
</compile_context>

<pallas_src>
import functools

import jax
import jax.numpy as jnp
from jax.experimental import pallas as pl
from jax.experimental.pallas import tpu as pltpu


_LANE = 128
_SUBLANE = 8


def _round_up(a, m):
    return ((a + m - 1) // m) * m


def _vmem_limit_bytes():
    """Scoped-VMEM limit, safe across v5e/v6e (128 MiB) and v7x (64 MiB/TC).

    Capped at 56 MiB = 64 MiB per-TensorCore minus ~8 MiB of Mosaic-internal
    headroom, so the setting stays valid even if vmem_capacity_bytes reports a
    per-chip figure on a 2-TC part and when both cores run CORE_PARALLEL.  A
    purely streaming kernel gains nothing from more VMEM than this.
    """
    try:
        cap = int(pltpu.get_tpu_info().vmem_capacity_bytes)
    except Exception:
        cap = 64 * 1024 * 1024
    cap = min(cap, 64 * 1024 * 1024)
    return max(cap - 8 * 1024 * 1024, 16 * 1024 * 1024)


def _choose_tile_rows(n_rows, width, itemsize, vmem_budget,
                      target_in_bytes=8 << 20):
    """Row-tile size for a streaming (HBM-bound) kernel.

    Big enough that each grid step moves ~target_in_bytes of input (so the
    ~0.35us per-step pipeline overhead is <5%), small enough that the
    double-buffered in/out blocks plus ~3 live f32 block temporaries fit the
    VMEM budget.
    """
    bytes_per_row = 4 * width * itemsize + 3 * width * 4
    tr_vmem = max(vmem_budget // bytes_per_row, _SUBLANE)
    tr_target = max(target_in_bytes // max(width * itemsize, 1), _SUBLANE)
    tr = min(tr_vmem, tr_target)
    tr = max((tr // _SUBLANE) * _SUBLANE, _SUBLANE)
    tr = min(tr, _round_up(max(n_rows, 1), _SUBLANE))
    return tr


# --------------------------------------------------------------------------
# Kernels
# --------------------------------------------------------------------------

def _rmsnorm_kernel_wide(x_ref, *rest, inv_d, eps, use_bias, use_mask):
    """dim >= 128 (already lane-dense).

    Ref order: x, [mask], scale, [offset], out.
    Blocks: x/o (tr, dim); mask/scale/offset (1, dim).
    """
    refs = list(rest)
    mask_ref = refs.pop(0) if use_mask else None
    scale_ref = refs.pop(0)
    offset_ref = refs.pop(0) if use_bias else None
    o_ref = refs.pop(0)

    x = x_ref[...].astype(jnp.float32)
    sq = x * x
    if use_mask:
        # Precomputed 0/1 mask for partial RMSNorm (first int(dim*p) features)
        # -- replaces the per-tile iota/compare/where.
        sq = sq * mask_ref[...]
    sumsq = jnp.sum(sq, axis=-1, keepdims=True)            # (tr, 1)
    denom = jnp.sqrt(sumsq * inv_d) + eps                  # rms + eps (as in torch)
    inv = 1.0 / denom                                      # exact f32; tr divides/tile
    out = (x * inv) * scale_ref[...].astype(jnp.float32)
    if use_bias:
        out = out + offset_ref[...].astype(jnp.float32)
    o_ref[...] = out.astype(o_ref.dtype)


def _rmsnorm_kernel_packed(x_ref, m_ref, scale_ref, *rest, inv_d, eps, use_bias):
    """dim < 128: g = 128 // dim logical rows packed per lane-row.

    Blocks: x/o (tr, 128); m (128, 128) block-diagonal group-sum matrix (also
    carries the partial-p mask); scale/offset (1, 128) = param tiled g times.
    One MXU matmul produces each group's sum of squares broadcast to every
    lane of the group.  f32 x f32 is emulated on v5e/v6e's bf16 MXU, but it
    runs on a different unit than the HBM stream and is hidden at the large
    row tiles used here.
    """
    if use_bias:
        offset_ref, o_ref = rest
    else:
        (o_ref,) = rest

    x = x_ref[...].astype(jnp.float32)                     # (tr, 128)
    sq = x * x
    sumsq = jnp.dot(sq, m_ref[...], preferred_element_type=jnp.float32)
    denom = jnp.sqrt(sumsq * inv_d) + eps
    out = (x / denom) * scale_ref[...].astype(jnp.float32)
    if use_bias:
        out = out + offset_ref[...].astype(jnp.float32)
    o_ref[...] = out.astype(o_ref.dtype)


# --------------------------------------------------------------------------
# Wrapper
# --------------------------------------------------------------------------

def _dimension_semantics_candidates(grid_steps, args):
    """Prefer CORE_PARALLEL (real 2-TensorCore sharding on v7x) for multi-step
    grids; always fall back to plain "parallel" if it is unsupported."""
    cands = []
    if grid_steps >= 2 and hasattr(pltpu, "CORE_PARALLEL"):
        try:
            traced = any(isinstance(a, jax.core.Tracer) for a in args)
        except Exception:
            traced = True
        if not traced:
            cands.append((pltpu.CORE_PARALLEL,))
    cands.append(("parallel",))
    return cands


def rmsnorm(x, scale, offset=None, *, p=-1.0, eps=1e-8):
    """RMSNorm forward.  x: (..., dim); scale/offset: (dim,)."""
    orig_shape = x.shape
    dim = x.shape[-1]
    x2d = x.reshape(-1, dim)               # free reshape (merges leading dims)
    rows = x2d.shape[0]

    # Partial RMSNorm: norm over the first int(dim*p) features (static).
    if p < 0.0 or p > 1.0:
        partial_size = dim
    else:
        partial_size = int(dim * p)
    if partial_size <= 0:
        raise ValueError("partial RMSNorm with int(dim * p) == 0 is ill-defined")
    inv_d = 1.0 / float(partial_size)
    use_bias = offset is not None

    # Lane-dense packing for narrow hidden sizes (dim divides 128).
    # TODO(synk): dims < 128 that do not divide 128 (e.g. 96) fall back to the
    # lane-sparse wide path; an lcm-based packing would make those lane-dense.
    pack = (dim < _LANE) and (_LANE % dim == 0) and (_LANE // dim > 1)
    g = _LANE // dim if pack else 1
    width = g * dim

    # Pad the row count only to a multiple of 8*g (sublane alignment for the
    # packed reshape).  Partial last row-tiles are handled by Pallas' masked
    # boundary stores, so there is no pad/slice round-trip when rows is
    # already aligned (the common case).  Padded rows are zeros -> 0/(0+eps);
    # requires eps > 0 (module default 1e-8); they are sliced off below.
    row_align = _SUBLANE * g
    pad_rows = (-rows) % row_align
    if pad_rows:
        x2d = jnp.pad(x2d, ((0, pad_rows), (0, 0)))
    n_packed_rows = (rows + pad_rows) // g
    xw = x2d.reshape(n_packed_rows, width)   # free reshape (row-major merge)

    vmem_limit = _vmem_limit_bytes()
    # The tile-size model already accounts for double-buffered in/out blocks
    # and f32 temporaries, so hand it ~80% of the limit (minus the tiny
    # scale/offset/mask/group-sum blocks) instead of hedging twice.
    budget = int(vmem_limit * 0.8) - (512 * 1024)
    tr = _choose_tile_rows(n_packed_rows, width, x.dtype.itemsize, budget)
    grid = (pl.cdiv(n_packed_rows, tr),)

    in_specs = [pl.BlockSpec((tr, width), lambda i: (i, 0))]
    args = [xw]

    use_mask = (not pack) and (partial_size < dim)
    if pack:
        # Block-diagonal group-sum matrix; also carries the partial-p mask.
        i_idx = jnp.arange(_LANE)[:, None]
        j_idx = jnp.arange(_LANE)[None, :]
        m = ((i_idx // dim == j_idx // dim)
             & ((i_idx % dim) < partial_size)).astype(jnp.float32)
        in_specs.append(pl.BlockSpec((_LANE, _LANE), lambda i: (0, 0)))
        args.append(m)
    elif use_mask:
        mask = (jnp.arange(dim) < partial_size).astype(jnp.float32).reshape(1, dim)
        in_specs.append(pl.BlockSpec((1, dim), lambda i: (0, 0)))
        args.append(mask)

    scale_w = (jnp.tile(scale.reshape(1, dim), (1, g)) if g > 1
               else scale.reshape(1, dim))
    in_specs.append(pl.BlockSpec((1, width), lambda i: (0, 0)))
    args.append(scale_w)
    if use_bias:
        offset_w = (jnp.tile(offset.reshape(1, dim), (1, g)) if g > 1
                    else offset.reshape(1, dim))
        in_specs.append(pl.BlockSpec((1, width), lambda i: (0, 0)))
        args.append(offset_w)

    if pack:
        kernel = functools.partial(_rmsnorm_kernel_packed, inv_d=inv_d,
                                   eps=float(eps), use_bias=use_bias)
    else:
        kernel = functools.partial(_rmsnorm_kernel_wide, inv_d=inv_d,
                                   eps=float(eps), use_bias=use_bias,
                                   use_mask=use_mask)

    out_shape = jax.ShapeDtypeStruct((n_packed_rows, width), x.dtype)
    out_spec = pl.BlockSpec((tr, width), lambda i: (i, 0))

    out = None
    last_exc = None
    for sem in _dimension_semantics_candidates(grid[0], args):
        try:
            out = pl.pallas_call(
                kernel,
                out_shape=out_shape,
                grid_spec=pltpu.PrefetchScalarGridSpec(
                    num_scalar_prefetch=0,
                    grid=grid,
                    in_specs=in_specs,
                    out_specs=out_spec),
                compiler_params=pltpu.CompilerParams(
                    dimension_semantics=sem,
                    vmem_limit_bytes=vmem_limit),
            )(*args)
            break
        except Exception as exc:   # CORE_PARALLEL unsupported -> fall back.
            last_exc = exc
            out = None
    if out is None:
        raise last_exc

    out2d = out.reshape(n_packed_rows * g, dim)   # free reshape (row-major split)
    if pad_rows:
        out2d = out2d[:rows]
    return out2d.reshape(orig_shape)


# --------------------------------------------------------------------------
# Pure-JAX reference (mirrors the PyTorch module), for verification.
# --------------------------------------------------------------------------

def _reference_rmsnorm(x, scale, offset=None, *, p=-1.0, eps=1e-8):
    dim = x.shape[-1]
    if p < 0.0 or p > 1.0:
        partial = x
        d_x = dim
    else:
        ps = int(dim * p)
        partial = x[..., :ps]
        d_x = ps
    norm_x = jnp.linalg.norm(partial, axis=-1, keepdims=True)
    rms_x = norm_x * (d_x ** -0.5)
    x_normed = x / (rms_x + eps)
    out = scale * x_normed
    if offset is not None:
        out = out + offset
    return out.astype(x.dtype)


if __name__ == "__main__":
    key = jax.random.PRNGKey(0)
    k1, k2, k3 = jax.random.split(key, 3)

    # --- Test 1: module config RMSNorm(dim=32, p=-1.0, eps=1e-8, bias=False)
    #     Exercises the lane-dense packed path (g = 128/32 = 4).
    dim = 32
    batch, seq = 2, 8
    x = jax.random.normal(k1, (batch, seq, dim), dtype=jnp.float32)
    scale = jnp.ones((dim,), dtype=jnp.float32)     # torch.ones(dim)

    out = jax.block_until_ready(rmsnorm(x, scale, offset=None, p=-1.0, eps=1e-8))
    ref = _reference_rmsnorm(x, scale, offset=None, p=-1.0, eps=1e-8)
    assert out.shape == x.shape and out.dtype == x.dtype
    assert jnp.allclose(out, ref, atol=5e-5, rtol=5e-5), "packed path mismatch"

    # --- Test 2: wide path (dim >= 128), ragged row count, partial p, bias.
    dim2 = 256
    x2 = jax.random.normal(k2, (3, 5, dim2), dtype=jnp.float32)   # 15 rows (ragged)
    scale2 = 1.0 + 0.1 * jax.random.normal(k3, (dim2,), dtype=jnp.float32)
    offset2 = 0.01 * jnp.arange(dim2, dtype=jnp.float32)
    out2 = jax.block_until_ready(
        rmsnorm(x2, scale2, offset=offset2, p=0.7, eps=1e-8))
    ref2 = _reference_rmsnorm(x2, scale2, offset=offset2, p=0.7, eps=1e-8)
    assert out2.shape == x2.shape and out2.dtype == x2.dtype
    assert jnp.allclose(out2, ref2, atol=5e-5, rtol=5e-5), "wide path mismatch"

    print("KERNEL_OK")
</pallas_src>

<mosaic_0001>
module attributes {stable_mosaic.version = 11 : i64} {
  func.func @_rmsnorm_kernel_packed(%arg0: i32, %arg1: memref<8x128xf32, #tpu.memory_space<vmem>>, %arg2: memref<128x128xf32, #tpu.memory_space<vmem>>, %arg3: memref<1x128xf32, #tpu.memory_space<vmem>>, %arg4: memref<8x128xf32, #tpu.memory_space<vmem>>) attributes {dimension_semantics = [#tpu.dimension_semantics<parallel>], iteration_bounds = array<i64: 1>, scalar_prefetch = 0 : i64, scratch_operands = 0 : i64, tpu.core_type = #tpu.core_type<tc>, window_params = [{transform_indices = @transform_0, window_bounds = array<i64: 8, 128>}, {pipeline_mode = #tpu.pipeline_mode<synchronous>, transform_indices = @transform_1, window_bounds = array<i64: 128, 128>}, {pipeline_mode = #tpu.pipeline_mode<synchronous>, transform_indices = @transform_2, window_bounds = array<i64: 1, 128>}, {transform_indices = @transform_3, window_bounds = array<i64: 8, 128>}]} {
    %c0 = arith.constant 0 : index
    %c0_0 = arith.constant 0 : index
    %0 = vector.load %arg1[%c0, %c0_0] : memref<8x128xf32, #tpu.memory_space<vmem>>, vector<8x128xf32>
    %1 = arith.mulf %0, %0 : vector<8x128xf32>
    %c0_1 = arith.constant 0 : index
    %c0_2 = arith.constant 0 : index
    %2 = vector.load %arg2[%c0_1, %c0_2] : memref<128x128xf32, #tpu.memory_space<vmem>>, vector<128x128xf32>
    %cst = arith.constant dense<0.000000e+00> : vector<8x128xf32>
    %3 = tpu.matmul %1, %2, %cst {dimension_numbers = #tpu.dot_dimension_numbers<[1], [0], [0], [1], [0, 0, 1, 1], [], []>} : vector<8x128xf32>, vector<128x128xf32>, vector<8x128xf32> -> vector<8x128xf32>
    %cst_3 = arith.constant 3.125000e-02 : f32
    %4 = vector.broadcast %cst_3 : f32 to vector<8x128xf32>
    %5 = arith.mulf %3, %4 : vector<8x128xf32>
    %6 = math.sqrt %5 : vector<8x128xf32>
    %cst_4 = arith.constant 9.99999993E-9 : f32
    %7 = vector.broadcast %cst_4 : f32 to vector<8x128xf32>
    %8 = arith.addf %6, %7 : vector<8x128xf32>
    %9 = arith.divf %0, %8 : vector<8x128xf32>
    %c0_5 = arith.constant 0 : index
    %c0_6 = arith.constant 0 : index
    %10 = vector.load %arg3[%c0_5, %c0_6] : memref<1x128xf32, #tpu.memory_space<vmem>>, vector<1x128xf32>
    %11 = vector.broadcast %10 : vector<1x128xf32> to vector<8x128xf32>
    %12 = arith.mulf %9, %11 : vector<8x128xf32>
    %c0_7 = arith.constant 0 : index
    %c0_8 = arith.constant 0 : index
    %13 = vector.load %arg4[%c0_7, %c0_8] : memref<8x128xf32, #tpu.memory_space<vmem>>, vector<8x128xf32>
    tpu.vector_store %arg4[%c0_7, %c0_8], %12 {strides = array<i32>} : memref<8x128xf32, #tpu.memory_space<vmem>>, vector<8x128xf32>,
    return
  }
  func.func @transform_0(%arg0: i32) -> (i32, i32) {
    %c0_i32 = arith.constant 0 : i32
    %c0_i32_0 = arith.constant 0 : i32
    return %arg0, %c0_i32 : i32, i32
  }
  func.func @transform_1(%arg0: i32) -> (i32, i32) {
    %c0_i32 = arith.constant 0 : i32
    %c0_i32_0 = arith.constant 0 : i32
    %c0_i32_1 = arith.constant 0 : i32
    return %c0_i32, %c0_i32_0 : i32, i32
  }
  func.func @transform_2(%arg0: i32) -> (i32, i32) {
    %c0_i32 = arith.constant 0 : i32
    %c0_i32_0 = arith.constant 0 : i32
    %c0_i32_1 = arith.constant 0 : i32
    return %c0_i32, %c0_i32_0 : i32, i32
  }
  func.func @transform_3(%arg0: i32) -> (i32, i32) {
    %c0_i32 = arith.constant 0 : i32
    %c0_i32_0 = arith.constant 0 : i32
    return %arg0, %c0_i32 : i32, i32
  }
}

</mosaic_0001>

<bundles_post_ra>
// kernel: tpu_custom_call.1
= control target key start
LH: loop header
LB: loop body
LE: loop exit
PB: predicated region body
PF: predicated region fallthrough
CT: control target
= control target key end

     0   :  { %8 = vsyncpa [#allocation3], 0  ;;  %s400_s0 = inlined_call_operand.hbm [shape: f32[8,128], index: 0, kind: input, shape index: {}]   ;;  %s401_s1 = inlined_call_operand.hbm [shape: f32[128,128], index: 1, kind: input, shape index: {}]   ;;  %s402_s2 = inlined_call_operand.vmem [shape: f32[1,128], index: 2, kind: input, shape index: {}]   ;;  %s403_s3 = inlined_call_operand.hbm [shape: f32[8,128], index: 3, kind: output, shape index: {}]  }
   0x1   :  { %9 = vsyncpa [#allocation6], 0 }
   0x2   :  { %10 = vsyncpa [#allocation4], 0  ;;  %s326_s12 = smov [#allocation2]   ;;  %s327_s14 = smov [#allocation5]  }
   0x3   :  { %s17_s13 = sshll.u32 %s326_s12, 4  ;;  %s26_s15 = sshll.u32 %s327_s14, 4  ;;  %s18_s13 = int_to_ptr.vmem [resolvable:$true] %s17_s13  ;;  %s354_s15 = int_to_ptr.vmem [resolvable:$true] %s26_s15 }
   0x4   :  { %s254_s18 = scalar_lea.hbm %s400_s0, 128 }
   0x5   :  { %p255_p0 = scmp.ne.s32.totalorder %s400_s0, %s254_s18  ;;  %p258_p1 = scmp.lt.u32.totalorder %s254_s18, %s400_s0 }
   0x7   :  { %p260_p2 = pnand %p258_p1, %p255_p0 }
   0x9   :  { %263 = shalt.err (!%p260_p2)
}
   0xa   :  { %s264_s23 = scalar_lea.vmem %s18_s13, 128  ;;  %p269_p4 = scmp.lt.s32.totalorder %s18_s13, %s18_s13 }
   0xb   :  { %p265_p3 = scmp.ne.s32.totalorder %s18_s13, %s264_s23  ;;  %p270_p5 = scmp.lt.s32.totalorder %s264_s23, %s264_s23 }
   0xd   :  { %p271_p6 = por %p270_p5, %p269_p4 }
   0xf   :  { %p272_p7 = pnand %p271_p6, %p265_p3 }
  0x11   :  { %275 = shalt.err (!%p272_p7)
}
  0x12   :  { %20 = dma.hbm_to_vmem [thread:$0]  %s400_s0, 128, %s18_s13, [#allocation3]  }
  0x13   :  { %s276_s28 = scalar_lea.hbm %s401_s1, 2048 }
  0x14   :  { %p277_p8 = scmp.ne.s32.totalorder %s401_s1, %s276_s28  ;;  %p280_p9 = scmp.lt.u32.totalorder %s276_s28, %s401_s1 }
  0x16   :  { %p282_p10 = pnand %p280_p9, %p277_p8 }
  0x18   :  { %285 = shalt.err (!%p282_p10)
}
  0x19   :  { %s286_s6 = scalar_lea.vmem %s354_s15, 2048  ;;  %p291_p12 = scmp.lt.s32.totalorder %s354_s15, %s354_s15 }
  0x1a   :  { %p287_p11 = scmp.ne.s32.totalorder %s354_s15, %s286_s6  ;;  %p292_p13 = scmp.lt.s32.totalorder %s286_s6, %s286_s6 }
  0x1c   :  { %p293_p0 = por %p292_p13, %p291_p12 }
  0x1e   :  { %p294_p1 = pnand %p293_p0, %p287_p11 }
  0x20   :  { %297 = shalt.err (!%p294_p1)
}
  0x21   :  { %s328_s0 = smov 128   ;;  %s329_s7 = smov 8  }
  0x22   :  { %32 = dma.hbm_to_vmem [thread:$0]  %s401_s1, 2048, %s354_s15, [#allocation6], %s328_s0, %s328_s0, %s329_s7  }
  0x23   :  { %320 = dma.done.wait [#allocation3], 128  }
  0x24   :  { %321 = vsyncadd [#allocation3], 4294967168 }
  0x25   :  { %322 = dma.done.wait [#allocation6], 2048  }
  0x26   :  { %323 = vsyncadd [#allocation6], 4294965248  ;;  %v330_v0 = vmov 0.0|0.0   ;;  %vm331_vm0 = vmmov 0   ;;  %v332_v1 = vmov 0.0   ;;  %v43_v2 = vld [vmem:[#allocation5] sm:$0xff] }
  0x27   :  { %218 = vmatprep.subr.bf16.mxu0 %v330_v0  ;;  %215 = vmatprep.mubr.msk.f32.mxu0 %vm331_vm0, %v332_v1  ;;  %v44_v3 = vld [vmem:[#allocation5 + $0x8] sm:$0xff]  ;;  %v45_v4 = vld [vmem:[#allocation5 + $0x10] sm:$0xff]  ;;  %v46_v6 = vld [vmem:[#allocation5 + $0x18] sm:$0xff]  ;;  %s333_s11 = smov [#allocation7]  }
  0x28   :  { %v219_v5 = vpack.c.bf16 %v44_v3, %v43_v2  ;;  %v222_v7 = vpack.c.bf16 %v46_v6, %v45_v4  ;;  %v47_v8 = vld [vmem:[#allocation5 + $0x20] sm:$0xff]  ;;  %v48_v9 = vld [vmem:[#allocation5 + $0x28] sm:$0xff]  ;;  %v49_v11 = vld [vmem:[#allocation5 + $0x30] sm:$0xff]  ;;  %s155_s12 = sshll.u32 %s333_s11, 4  ;;  %s156_s12 = int_to_ptr.vmem [resolvable:$true] %s155_s12 }
  0x29   :  { %v225_v10 = vpack.c.bf16 %v48_v9, %v47_v8  ;;  %v50_v12 = vld [vmem:[#allocation5 + $0x38] sm:$0xff]  ;;  %v51_v14 = vld [vmem:[#allocation5 + $0x40] sm:$0xff]  ;;  %v52_v15 = vld [vmem:[#allocation5 + $0x48] sm:$0xff]  ;;  %s298_s13 = scalar_lea.vmem %s156_s12, 128  ;;  %p303_p3 = scmp.lt.s32.totalorder %s156_s12, %s156_s12 }
  0x2a   :  { %220 = vmatpush3.bf16.msra.mxu0 %v219_v5  ;;  %v228_v13 = vpack.c.bf16 %v50_v12, %v49_v11  ;;  %v231_v16 = vpack.c.bf16 %v52_v15, %v51_v14  ;;  %v53_v17 = vld [vmem:[#allocation5 + $0x50] sm:$0xff]  ;;  %v54_v18 = vld [vmem:[#allocation5 + $0x58] sm:$0xff]  ;;  %v55_v20 = vld [vmem:[#allocation5 + $0x60] sm:$0xff]  ;;  %p299_p2 = scmp.ne.s32.totalorder %s156_s12, %s298_s13  ;;  %p304_p4 = scmp.lt.s32.totalorder %s298_s13, %s298_s13 }
  0x2b   :  { %221 = vmatprep.subr.bf16.mxu0 %v330_v0  ;;  %v234_v19 = vpack.c.bf16 %v54_v18, %v53_v17  ;;  %v56_v21 = vld [vmem:[#allocation5 + $0x68] sm:$0xff]  ;;  %v57_v23 = vld [vmem:[#allocation5 + $0x70] sm:$0xff]  ;;  %v58_v24 = vld [vmem:[#allocation5 + $0x78] sm:$0xff] }
  0x2c   :  { %v237_v22 = vpack.c.bf16 %v56_v21, %v55_v20  ;;  %v240_v25 = vpack.c.bf16 %v58_v24, %v57_v23  ;;  %v41_v26 = vld [vmem:[#allocation2] sm:$0xff]  ;;  %p305_p5 = por %p304_p4, %p303_p3 }
  0x2d   :  { %v42_v27 = vmul.f32 %v41_v26, %v41_v26  ;;  %v165_v38 = vld [vmem:[%s402_s2] ss:$0 sm:$0xff] }
  0x2e   :  { %223 = vmatpush3.bf16.msra.mxu0 %v222_v7  ;;  %p306_p6 = pnand %p305_p5, %p299_p2 }
  0x2f   :  { %224 = vmatprep.subr.bf16.mxu0 %v330_v0 }
  0x32   :  { %226 = vmatpush3.bf16.msra.mxu0 %v225_v10 }
  0x33   :  { %227 = vmatprep.subr.bf16.mxu0 %v330_v0 }
  0x36   :  { %229 = vmatpush3.bf16.msra.mxu0 %v228_v13 }
  0x37   :  { %230 = vmatprep.subr.bf16.mxu0 %v330_v0 }
  0x3a   :  { %232 = vmatpush3.bf16.msra.mxu0 %v231_v16 }
  0x3b   :  { %233 = vmatprep.subr.bf16.mxu0 %v330_v0 }
  0x3e   :  { %235 = vmatpush3.bf16.msra.mxu0 %v234_v19 }
  0x3f   :  { %236 = vmatprep.subr.bf16.mxu0 %v330_v0 }
  0x42   :  { %238 = vmatpush3.bf16.msra.mxu0 %v237_v22 }
  0x43   :  { %239 = vmatprep.subr.bf16.mxu0 %v330_v0 }
  0x46   :  { %241 = vmatpush3.bf16.msra.mxu0 %v240_v25 }
  0x49   :  { %216 = vmatmul.mubr.f32.vlgmr.msra.gmra.mrb[0].mxu0 %v42_v27 }
 0x11c   :  { %v125_v28 = vpop.f32.mrb[0].mxu0 }
 0x11d   :  { %v129_v29 = vmul.f32 0.03125, %v125_v28  ;;  %v217_v30 = vpop.f32.mrb[1].mxu0 }
 0x11f   :  { %250 = vrsqrt.f32 %v129_v29  ;;  %vm132_vm1 = vcmp.eq.f32.partialorder %v129_v29, inf  ;;  %v135_v33 = vand.u32 2147483648, %v129_v29  ;;  %vm134_vm2 = vcmp.eq.f32.partialorder %v129_v29, 0.0 }
 0x129   :  { %v251_v31 = vpop.eup %250 }
 0x12a   :  { %v131_v32 = vmul.f32 %v251_v31, %v129_v29 }
 0x12c   :  { %v133_v34 = vsel %vm132_vm1, %v129_v29, %v131_v32 }
 0x12d   :  { %v136_v35 = vsel %vm134_vm2, %v135_v33, %v133_v34 }
 0x12e   :  { %v137_v36 = vadd.f32 1e-08, %v136_v35 }
 0x130   :  { %252 = vrcp.f32 %v137_v36 }
 0x13a   :  { %v253_v37 = vpop.eup %252 }
 0x13b   :  { %v139_v39 = vmul.f32 %v253_v37, %v41_v26 }
 0x13d   :  { %v147_v40 = vmul.f32 %v165_v38, %v139_v39 }
 0x13f   :  { %148 = vst [vmem:[#allocation7] sm:$0xff] %v147_v40 }
 0x140   :  { %309 = shalt.err (!%p306_p6)
}
 0x141   :  { %s310_s16 = scalar_lea.hbm %s403_s3, 128 }
 0x142   :  { %p311_p7 = scmp.ne.s32.totalorder %s403_s3, %s310_s16  ;;  %p314_p8 = scmp.lt.u32.totalorder %s310_s16, %s403_s3 }
 0x144   :  { %p316_p9 = pnand %p314_p8, %p311_p7 }
 0x146   :  { %319 = shalt.err (!%p316_p9)
}
 0x147   :  { %158 = dma.vmem_to_hbm [thread:$0]  %s156_s12, 128, %s403_s3, [#allocation4]  }
 0x148   :  { %324 = dma.done.wait [#allocation4], 128  }
 0x149   :  { %325 = vsyncadd [#allocation4], 4294967168 }
 0x14a   :  { %162 = vsyncpa [#allocation3], 1 }
 0x14b   :  { %163 = vsyncpa [#allocation6], 1 }
 0x14c   :  { %164 = vsyncpa [#allocation4], 1 }

</bundles_post_ra>
